<compile_context>
chip_gen: v7x
topology: tpu7x:2x2x1
jax: 0.10.0
libtpu: 0.0.40
codegen_flags: <defaults>
</compile_context>

<pallas_src>
import jax
import jax.numpy as jnp
from jax import lax
from jax.experimental import pallas as pl
from jax.experimental.pallas import tpu as pltpu

EPS = 1e-5


def gbn_kernel(x_ref, gamma_ref, beta_ref, o_ref):
    # x_ref: (k, vbs, td) — k virtual batches, vbs rows each, td features.
    x = x_ref[...]
    xf = x.astype(jnp.float32)
    inv_n = jnp.float32(1.0 / x.shape[1])

    # Single-pass statistics over the virtual-batch (rows) axis, f32 accum.
    s1 = jnp.sum(xf, axis=1, keepdims=True)                    # (k, 1, td)
    s2 = jnp.sum(xf * xf, axis=1, keepdims=True)               # (k, 1, td)
    mean = s1 * inv_n
    var = jnp.maximum(s2 * inv_n - mean * mean, 0.0)           # biased, clamped

    # Fold normalization + affine into one scale/shift per (chunk, feature).
    a = gamma_ref[...] * lax.rsqrt(var + EPS)                  # (k, 1, td)
    b = beta_ref[...] - mean * a                               # (k, 1, td)

    if x.dtype.itemsize == 2:
        # bf16/f16 path: stats were f32, final normalize in the input dtype.
        o_ref[...] = x * a.astype(x.dtype) + b.astype(x.dtype)
    else:
        o_ref[...] = (xf * a + b).astype(o_ref.dtype)


def _largest_divisor_leq(n, cap):
    cap = max(1, min(int(cap), int(n)))
    for k in range(cap, 0, -1):
        if n % k == 0:
            return k
    return 1


def gbn_forward(x, gamma, beta, virtual_batch_size=512, max_feature_tile=1024):
    """Ghost BatchNorm forward (training semantics).

    x:     (B, D)
    gamma: (D,)  BN weight
    beta:  (D,)  BN bias
    """
    B, D = x.shape
    vbs = min(virtual_batch_size, B)
    # TODO(synk): PyTorch's torch.chunk allows a smaller trailing chunk when
    # B % virtual_batch_size != 0; a static grid requires divisibility here.
    assert B % vbs == 0, "batch must be divisible by virtual_batch_size"
    n_chunks = B // vbs

    sublane = 16 if x.dtype.itemsize == 2 else 8
    assert vbs % sublane == 0 or vbs == B, (
        f"virtual_batch_size must be a multiple of {sublane} for dtype {x.dtype}"
    )

    # ---- feature-axis tiling ------------------------------------------------
    if D <= max_feature_tile:
        td = D                       # full feature axis in one (legal) tile
        n_dtiles = 1
    else:
        td = max(128, (max_feature_tile // 128) * 128)   # lane-dense tiles
        n_dtiles = pl.cdiv(D, td)                        # partial last tile OK

    # ---- VMEM-budgeted chunk packing ---------------------------------------
    try:
        vmem_cap = int(pltpu.get_tpu_info().vmem_capacity_bytes)
    except Exception:
        vmem_cap = 64 << 20          # conservative (v7x) fallback
    scoped_limit = min(vmem_cap // 2, 64 << 20)

    itemsize = x.dtype.itemsize
    # Per block element: 2x-buffered input + 2x-buffered output + ~2 f32 temps.
    bytes_per_elem = 4 * itemsize + 8
    # Make sure even a single-chunk block fits under the limit.
    scoped_limit = min(vmem_cap, max(scoped_limit,
                                     vbs * td * bytes_per_elem + (2 << 20)))
    budget = scoped_limit - (2 << 20)

    max_block_elems = max(vbs * td, budget // bytes_per_elem)
    k_target = max(1, max_block_elems // (vbs * td))
    if n_dtiles == 1 and n_chunks >= 2:
        # Keep >= 2 grid steps so both TensorCores get work on v7x.
        k_target = min(k_target, n_chunks // 2)
    k = _largest_divisor_leq(n_chunks, k_target)
    n_groups = n_chunks // k

    # ---- free (metadata-only) views -----------------------------------------
    x3 = x.reshape(n_chunks, vbs, D)
    gamma3 = gamma.reshape(1, 1, D).astype(jnp.float32)
    beta3 = beta.reshape(1, 1, D).astype(jnp.float32)

    out = pl.pallas_call(
        gbn_kernel,
        out_shape=jax.ShapeDtypeStruct((n_chunks, vbs, D), x.dtype),
        grid_spec=pltpu.PrefetchScalarGridSpec(
            num_scalar_prefetch=0,
            # (feature-tile, chunk-group): chunk-group innermost so gamma/beta
            # tiles stay resident while x/out blocks stream.
            grid=(n_dtiles, n_groups),
            in_specs=[
                pl.BlockSpec((k, vbs, td), lambda j, g: (g, 0, j)),   # x
                pl.BlockSpec((1, 1, td), lambda j, g: (0, 0, j)),     # gamma
                pl.BlockSpec((1, 1, td), lambda j, g: (0, 0, j)),     # beta
            ],
            out_specs=pl.BlockSpec((k, vbs, td), lambda j, g: (g, 0, j)),
        ),
        compiler_params=pltpu.CompilerParams(
            dimension_semantics=("parallel", "parallel"),
            vmem_limit_bytes=int(scoped_limit),
        ),
    )(x3, gamma3, beta3)

    return out.reshape(B, D)


def gbn_reference(x, gamma, beta, virtual_batch_size):
    """Pure-JAX reference mirroring the PyTorch training forward."""
    B, D = x.shape
    vbs = min(virtual_batch_size, B)
    n_chunks = B // vbs
    outs = []
    for c in range(n_chunks):
        xc = x[c * vbs:(c + 1) * vbs].astype(jnp.float32)
        mean = xc.mean(axis=0, keepdims=True)
        var = ((xc - mean) ** 2).mean(axis=0, keepdims=True)
        y = (xc - mean) / jnp.sqrt(var + EPS) * gamma.reshape(1, D).astype(jnp.float32) \
            + beta.reshape(1, D).astype(jnp.float32)
        outs.append(y.astype(x.dtype))
    return jnp.concatenate(outs, axis=0)


if __name__ == "__main__":
    key = jax.random.PRNGKey(0)
    k1, k2, k3, k4, k5, k6 = jax.random.split(key, 6)

    # --- case 1: small feature dim (D=32 < 128, masked-lane store), 2 chunks --
    B, D, VBS = 16, 32, 8
    x = jax.random.normal(k1, (B, D), dtype=jnp.float32)
    g = 1.0 + 0.1 * jax.random.normal(k2, (D,), dtype=jnp.float32)
    b = 0.1 * jax.random.normal(k3, (D,), dtype=jnp.float32)
    out = jax.block_until_ready(gbn_forward(x, g, b, virtual_batch_size=VBS))
    ref = gbn_reference(x, g, b, VBS)
    assert out.shape == (B, D) and out.dtype == x.dtype
    assert jnp.allclose(out, ref, atol=1e-4, rtol=1e-4), "mismatch (case 1)"

    # --- case 2: D=200 in a single full-width feature tile, packed chunks -----
    B2, D2, VBS2 = 32, 200, 8
    x2 = jax.random.normal(k4, (B2, D2), dtype=jnp.float32)
    g2 = 1.0 + 0.05 * jax.random.normal(k2, (D2,), dtype=jnp.float32)
    b2 = 0.05 * jax.random.normal(k3, (D2,), dtype=jnp.float32)
    out2 = jax.block_until_ready(gbn_forward(x2, g2, b2, virtual_batch_size=VBS2))
    ref2 = gbn_reference(x2, g2, b2, VBS2)
    assert jnp.allclose(out2, ref2, atol=1e-4, rtol=1e-4), "mismatch (case 2)"

    # --- case 3: D=200 with 128-wide tiles -> masked partial trailing tile ----
    out3 = jax.block_until_ready(
        gbn_forward(x2, g2, b2, virtual_batch_size=VBS2, max_feature_tile=128))
    assert jnp.allclose(out3, ref2, atol=1e-4, rtol=1e-4), "mismatch (case 3)"

    # --- case 4: bf16 passthrough (f32 stats, bf16 normalize) -----------------
    B4, D4, VBS4 = 64, 128, 16
    x4 = jax.random.normal(k5, (B4, D4), dtype=jnp.float32).astype(jnp.bfloat16)
    g4 = (1.0 + 0.1 * jax.random.normal(k6, (D4,), dtype=jnp.float32))
    b4 = 0.1 * jax.random.normal(k2, (D4,), dtype=jnp.float32)
    out4 = jax.block_until_ready(gbn_forward(x4, g4, b4, virtual_batch_size=VBS4))
    ref4 = gbn_reference(x4, g4, b4, VBS4)
    assert out4.dtype == jnp.bfloat16
    assert jnp.allclose(out4.astype(jnp.float32), ref4.astype(jnp.float32),
                        atol=2e-2, rtol=2e-2), "mismatch (case 4, bf16)"

    print("KERNEL_OK")
</pallas_src>

<mosaic_0001>
module attributes {stable_mosaic.version = 11 : i64} {
  func.func @gbn_kernel(%arg0: i32, %arg1: i32, %arg2: memref<1x8x32xf32, #tpu.memory_space<vmem>>, %arg3: memref<1x1x32xf32, #tpu.memory_space<vmem>>, %arg4: memref<1x1x32xf32, #tpu.memory_space<vmem>>, %arg5: memref<1x8x32xf32, #tpu.memory_space<vmem>>) attributes {dimension_semantics = [#tpu.dimension_semantics<parallel>, #tpu.dimension_semantics<parallel>], iteration_bounds = array<i64: 1, 2>, scalar_prefetch = 0 : i64, scratch_operands = 0 : i64, tpu.core_type = #tpu.core_type<tc>, window_params = [{transform_indices = @transform_0, window_bounds = array<i64: 1, 8, 32>}, {transform_indices = @transform_1, window_bounds = array<i64: 1, 1, 32>}, {transform_indices = @transform_2, window_bounds = array<i64: 1, 1, 32>}, {transform_indices = @transform_3, window_bounds = array<i64: 1, 8, 32>}]} {
    %c0 = arith.constant 0 : index
    %c0_0 = arith.constant 0 : index
    %c0_1 = arith.constant 0 : index
    %0 = vector.load %arg2[%c0, %c0_0, %c0_1] : memref<1x8x32xf32, #tpu.memory_space<vmem>>, vector<1x8x32xf32>
    %cst = arith.constant dense<0.000000e+00> : vector<1x32xf32>
    %1 = vector.multi_reduction <add>, %0, %cst [1] : vector<1x8x32xf32> to vector<1x32xf32>
    %2 = vector.shape_cast %1 : vector<1x32xf32> to vector<1x1x32xf32>
    %3 = arith.mulf %0, %0 : vector<1x8x32xf32>
    %cst_2 = arith.constant dense<0.000000e+00> : vector<1x32xf32>
    %4 = vector.multi_reduction <add>, %3, %cst_2 [1] : vector<1x8x32xf32> to vector<1x32xf32>
    %5 = vector.shape_cast %4 : vector<1x32xf32> to vector<1x1x32xf32>
    %cst_3 = arith.constant 1.250000e-01 : f32
    %6 = vector.broadcast %cst_3 : f32 to vector<1x1x32xf32>
    %7 = arith.mulf %2, %6 : vector<1x1x32xf32>
    %cst_4 = arith.constant 1.250000e-01 : f32
    %8 = vector.broadcast %cst_4 : f32 to vector<1x1x32xf32>
    %9 = arith.mulf %5, %8 : vector<1x1x32xf32>
    %10 = arith.mulf %7, %7 : vector<1x1x32xf32>
    %11 = arith.subf %9, %10 : vector<1x1x32xf32>
    %cst_5 = arith.constant 0.000000e+00 : f32
    %12 = vector.broadcast %cst_5 : f32 to vector<1x1x32xf32>
    %13 = arith.maximumf %11, %12 : vector<1x1x32xf32>
    %c0_6 = arith.constant 0 : index
    %c0_7 = arith.constant 0 : index
    %c0_8 = arith.constant 0 : index
    %14 = vector.load %arg3[%c0_6, %c0_7, %c0_8] : memref<1x1x32xf32, #tpu.memory_space<vmem>>, vector<1x1x32xf32>
    %cst_9 = arith.constant 9.99999974E-6 : f32
    %15 = vector.broadcast %cst_9 : f32 to vector<1x1x32xf32>
    %16 = arith.addf %13, %15 : vector<1x1x32xf32>
    %17 = math.rsqrt %16 : vector<1x1x32xf32>
    %18 = arith.mulf %14, %17 : vector<1x1x32xf32>
    %c0_10 = arith.constant 0 : index
    %c0_11 = arith.constant 0 : index
    %c0_12 = arith.constant 0 : index
    %19 = vector.load %arg4[%c0_10, %c0_11, %c0_12] : memref<1x1x32xf32, #tpu.memory_space<vmem>>, vector<1x1x32xf32>
    %20 = arith.mulf %7, %18 : vector<1x1x32xf32>
    %21 = arith.subf %19, %20 : vector<1x1x32xf32>
    %22 = vector.broadcast %18 : vector<1x1x32xf32> to vector<1x8x32xf32>
    %23 = arith.mulf %0, %22 : vector<1x8x32xf32>
    %24 = vector.broadcast %21 : vector<1x1x32xf32> to vector<1x8x32xf32>
    %25 = arith.addf %23, %24 : vector<1x8x32xf32>
    %c0_13 = arith.constant 0 : index
    %c0_14 = arith.constant 0 : index
    %c0_15 = arith.constant 0 : index
    %26 = vector.load %arg5[%c0_13, %c0_14, %c0_15] : memref<1x8x32xf32, #tpu.memory_space<vmem>>, vector<1x8x32xf32>
    tpu.vector_store %arg5[%c0_13, %c0_14, %c0_15], %25 {strides = array<i32>} : memref<1x8x32xf32, #tpu.memory_space<vmem>>, vector<1x8x32xf32>,
    return
  }
  func.func @transform_0(%arg0: i32, %arg1: i32) -> (i32, i32, i32) {
    %c0_i32 = arith.constant 0 : i32
    %c0_i32_0 = arith.constant 0 : i32
    return %arg1, %c0_i32, %arg0 : i32, i32, i32
  }
  func.func @transform_1(%arg0: i32, %arg1: i32) -> (i32, i32, i32) {
    %c0_i32 = arith.constant 0 : i32
    %c0_i32_0 = arith.constant 0 : i32
    %c0_i32_1 = arith.constant 0 : i32
    return %c0_i32, %c0_i32_0, %arg0 : i32, i32, i32
  }
  func.func @transform_2(%arg0: i32, %arg1: i32) -> (i32, i32, i32) {
    %c0_i32 = arith.constant 0 : i32
    %c0_i32_0 = arith.constant 0 : i32
    %c0_i32_1 = arith.constant 0 : i32
    return %c0_i32, %c0_i32_0, %arg0 : i32, i32, i32
  }
  func.func @transform_3(%arg0: i32, %arg1: i32) -> (i32, i32, i32) {
    %c0_i32 = arith.constant 0 : i32
    %c0_i32_0 = arith.constant 0 : i32
    return %arg1, %c0_i32, %arg0 : i32, i32, i32
  }
}

</mosaic_0001>

<bundles_post_ra>
// kernel: tpu_custom_call.1
= control target key start
LH: loop header
LB: loop body
LE: loop exit
PB: predicated region body
PF: predicated region fallthrough
CT: control target
= control target key end

     0   :  { %8 = vsyncpa [#allocation3], 0  ;;  %s794_s0 = inlined_call_operand.hbm [shape: f32[2,8,32], index: 0, kind: input, shape index: {}]   ;;  %s795_s1 = inlined_call_operand.vmem [shape: f32[1,1,32], index: 1, kind: input, shape index: {}]   ;;  %s796_s2 = inlined_call_operand.vmem [shape: f32[1,1,32], index: 2, kind: input, shape index: {}]   ;;  %s797_s3 = inlined_call_operand.hbm [shape: f32[2,8,32], index: 3, kind: output, shape index: {}]  }
   0x1   :  { %10 = vsyncpa [#allocation3 + $0x1], 0 }
   0x2   :  { %11 = vsyncpa [#allocation4], 0 }
   0x3   :  { %13 = vsyncpa [#allocation4 + $0x1], 0  ;;  %s609_s12 = smov 0   ;;  %s611_s13 = smov 0  }
   0x4   :  { %s613_s14 = smov 0   ;;  %s615_s15 = smov 0  }
   0x5   :  { %s617_s16 = smov 0   ;;  %s619_s17 = smov 0  }
   0x6 LB: > { %s394_s18 = sadd.s32 4294967295, %s585_s17   ;;  %s395_s19 = sadd.s32 4294967294, %s585_s17   ;;  %s585_s17 = sphi %s619_s17, %s19_s17   ;;  %s581_s16 = sphi %s617_s16, %s813_s16   ;;  %s577_s15 = sphi %s615_s15, %s812_s15   ;;  %s573_s14 = sphi %s613_s14, %s811_s14   ;;  %s569_s13 = sphi %s611_s13, %s810_s13   ;;  %s565_s12 = sphi %s609_s12, %s809_s12  }
   0x7   : > { %s28_s20 = sadd.s32 1, %s581_s16  ;;  %s40_s21 = sadd.s32 1, %s573_s14 }
   0x8   : > { %p29_p0 = scmp.ge.s32.totalorder %s28_s20, 2  ;;  %p47_p1 = scmp.ne.s32.totalorder %s573_s14, %s569_s13 }
   0x9   : > { %p48_p2 = scmp.eq.s32.totalorder %s585_s17, 0  ;;  %p53_p3 = scmp.ne.s32.totalorder %s569_s13, %s565_s12 }
   0xa   : > { %s815_s20 = smov (%p29_p0, %s28_s20), 0  ;;  %p54_p5 = scmp.eq.s32.totalorder %s394_s18, 0 }
   0xb   : > { %p650_p4 = por %p48_p2, %p47_p1  ;;  %s35_s23 = ssub.s32 %s581_s16, %s815_s20 }
   0xc   : > { %p131_p6 = scmp.eq.s32.totalorder %s394_s18, 1  ;;  %p38_p7 = scmp.eq.s32.totalorder %s35_s23, 0 }
   0xd   : > { %p656_p8 = por %p54_p5, %p53_p3  ;;  %p137_p10 = scmp.eq.s32.totalorder %s395_s19, 1 }
   0xe   : > { %p660_p9 = por %p131_p6, %p47_p1  ;;  %p421_p13 = scmp.lt.s32.totalorder %s585_s17, 2 }
   0xf   : > { %s665_s26 = scalar_select %p38_p7, %s573_s14, %s40_s21  }
  0x10   : > { %s801_s25 = scalar_select %p660_p9, 1, 0 }
  0x11   : > { %p667_p11 = por %p137_p10, %p53_p3  ;;  %s169_s28 = sand.u32 1, %s573_s14  }
  0x12   : > { %s400_s29 = sshll.u32 %s169_s28, 3  ;;  %s401_s30 = sshll.u32 %s581_s16, 7 }
  0x13   : > { %s802_s27 = scalar_select %p667_p11, 1, 0 }
  0x14   : > { %s678_s6 = scalar_lea.hbm %s794_s0, %s401_s30  ;;  %s173_s7 = scalar_lea.vmem [#allocation2], %s400_s29 }
  0x15   : > { %s181_s8 = sshll.u32 %s173_s7, 4  ;;  %p684_p0 = pnand %p421_p13, %p650_p4  ;;  %s680_s8 = int_to_ptr.vmem [resolvable:$true] %s181_s8 }
  0x16   : > { %s170_s10 = scalar_lea.sflag [#allocation3], %s169_s28  ;;  %s473_s11 = scalar_lea.hbm %s678_s6, 128 }
  0x17   : > { %p474_p3 = scmp.ne.s32.totalorder %s678_s6, %s473_s11  ;;  %p475_p5 = pneg %p684_p0 }
  0x18   : > { %s478_s21 = scalar_lea.hbm %s794_s0, 256  ;;  %p479_p4 = scmp.lt.u32.totalorder %s678_s6, %s794_s0 }
  0x19   : > { %p476_p6 = pnand %p475_p5, %p474_p3  ;;  %p480_p10 = scmp.lt.u32.totalorder %s478_s21, %s473_s11 }
  0x1a   : > { %p482_p12 = scmp.lt.u32.totalorder %s473_s11, %s678_s6 }
  0x1b   : > { %p477_p7 = pneg %p476_p6  ;;  %p481_p13 = por %p480_p10, %p479_p4 }
  0x1d   : > { %p483_p1 = por %p482_p12, %p481_p13 }
  0x1f   : > { %p484_p2 = pnand %p483_p1, %p477_p7 }
  0x21   : > { %487 = shalt.err (!%p484_p2)
}
  0x22   : > { %s488_s28 = scalar_lea.vmem %s680_s8, 128  ;;  %s587_s29 = smov [#allocation2]  }
  0x23   : > { %p489_p3 = scmp.ne.s32.totalorder %s680_s8, %s488_s28  ;;  %s493_s30 = sshll.u32 %s587_s29, 4  ;;  %s494_s30 = int_to_ptr.vmem [resolvable:$false] %s493_s30 }
  0x24   : > { %s495_s4 = scalar_lea.vmem %s494_s30, 256  ;;  %p496_p9 = scmp.lt.s32.totalorder %s680_s8, %s494_s30 }
  0x25   : > { %p491_p6 = pnand %p489_p3, %p475_p5  ;;  %p497_p4 = scmp.lt.s32.totalorder %s495_s4, %s488_s28 }
  0x27   : > { %p492_p11 = pneg %p491_p6  ;;  %p498_p10 = por %p497_p4, %p496_p9 }
  0x29   : > { %p499_p12 = pnand %p498_p10, %p492_p11 }
  0x2b   : > { %502 = shalt.err (!%p499_p12)
}
  0x2c   : > { %416 = dma.hbm_to_vmem [thread:$0]  (!%p684_p0), %s678_s6, 128, %s680_s8, %s170_s10  }
  0x2d   : > { %p804_p1 = scmp.lt.s32.totalorder %s585_s17, 3  ;;  %p805_p2 = scmp.ge.s32.totalorder %s585_s17, 1 }
  0x2f   : > { %p187_p5 = pnand %p805_p2, %p804_p1 }
  0x30   : > { %s720_s5 = sand.u32 (!%p187_p5), 1, %s569_s13  }
  0x31   : > { %190 = sbr.rel (%p187_p5) target bundleno = 116 (0x74), region = 32  ;;  %s403_s7 = sshll.u32 (!%p187_p5), %s720_s5, 3 }
  0x32   : > { %s193_s11 = scalar_lea.sflag (!%p187_p5), [#allocation3], %s720_s5  ;;  %s196_s9 = scalar_lea.vmem (!%p187_p5), [#allocation2], %s403_s7 }
  0x38   : > { %556 = dma.done.wait (%p656_p8), %s193_s11, 128  }
  0x39   : > { %558 = vsyncadd (%p656_p8), %s193_s11, 4294967168  ;;  %vm232_vm0 = vcmask 261120   ;;  %v231_v0 = vld [vmem:[%s196_s9] sm:$0xff]  ;;  %v261_v22 = vlaneseq  ;;  %s224_s18 = scalar_lea.vmem [#allocation5], %s403_s7  ;;  %s406_s21 = sshll.u32 %s577_s15, 7 }
  0x3a   : > { %v233_v1 = vsel %vm232_vm0, %v231_v0, 0.0  ;;  %v240_v2 = vmul.f32 %v231_v0, %v231_v0  ;;  %v253_v24 = vld [vmem:[%s795_s1] sm:$0x1]  ;;  %s290_s19 = sshll.u32 %s224_s18, 4  ;;  %s746_s28 = scalar_lea.hbm %s797_s3, %s406_s21  ;;  %s741_s19 = int_to_ptr.vmem [resolvable:$true] %s290_s19 }
  0x3b   : > { %v234_v3 = vrot.slane %v233_v1, 4  ;;  %v262_v23 = vshrl.u32 %v261_v22, 7  ;;  %v257_v28 = vld [vmem:[%s796_s2] sm:$0x1]  ;;  %s276_s29 = scalar_lea.sflag [#allocation4], %s720_s5  ;;  %s503_s30 = scalar_lea.vmem %s741_s19, 128 }
  0x3c   : > { %v241_v4 = vsel %vm232_vm0, %v240_v2, 0.0  ;;  %p504_p8 = scmp.ne.s32.totalorder %s741_s19, %s503_s30  ;;  %p806_p9 = scmp.ne.s32.totalorder %s801_s25, 0 }
  0x3d   : > { %v235_v5 = vadd.f32 %v234_v3, %v233_v1  ;;  %v242_v6 = vrot.slane %v241_v4, 4  ;;  %v263_v25 = vsub.s32 0, %v262_v23  ;;  %s588_s15 = smov [#allocation5]  }
  0x3e   : > { %p505_p11 = pnand %p504_p8, %p806_p9  ;;  %s507_s4 = sshll.u32 %s588_s15, 4  ;;  %s508_s4 = int_to_ptr.vmem [resolvable:$false] %s507_s4 }
  0x3f   : > { %v236_v7 = vrot.slane %v235_v5, 2  ;;  %v243_v8 = vadd.f32 %v242_v6, %v241_v4  ;;  %s509_s7 = scalar_lea.vmem %s508_s4, 256  ;;  %p510_p7 = scmp.lt.s32.totalorder %s741_s19, %s508_s4 }
  0x40   : > { %p506_p0 = pneg %p505_p11  ;;  %p511_p13 = scmp.lt.s32.totalorder %s509_s7, %s503_s30 }
  0x41   : > { %v237_v9 = vadd.f32 %v236_v7, %v235_v5  ;;  %v244_v10 = vrot.slane %v243_v8, 2 }
  0x42   : > { %p512_p3 = por %p511_p13, %p510_p7 }
  0x43   : > { %v238_v11 = vrot.slane %v237_v9, 1  ;;  %v245_v12 = vadd.f32 %v244_v10, %v243_v8 }
  0x44   : > { %p513_p6 = pnand %p512_p3, %p506_p0 }
  0x45   : > { %v239_v13 = vadd.f32 %v238_v11, %v237_v9  ;;  %v246_v14 = vrot.slane %v245_v12, 1 }
  0x47   : > { %v247_v15 = vadd.f32 %v246_v14, %v245_v12  ;;  %v248_v16 = vmul.f32 0.125, %v239_v13 }
  0x49   : > { %v249_v17 = vmul.f32 0.125, %v247_v15  ;;  %v250_v18 = vmul.f32 %v248_v16, %v248_v16 }
  0x4b   : > { %v251_v19 = vsub.f32 %v249_v17, %v250_v18 }
  0x4d   : > { %v252_v20 = vmax.f32 %v251_v19, 0.0 }
  0x4f   : > { %v254_v21 = vadd.f32 1e-05, %v252_v20 }
  0x51   : > { %471 = vrsqrt.f32 %v254_v21 }
  0x5b   : > { %v472_v26 = vpop.eup %471 }
  0x5c   : > { %v256_v27 = vmul.f32 %v472_v26, %v253_v24 }
  0x5e   : > { %v258_v29 = vmul.f32 %v256_v27, %v248_v16  ;;  %v264_v30 = vrot.slane %v256_v27, %v263_v25 }
  0x60   : > { %v259_v31 = vsub.f32 %v257_v28, %v258_v29  ;;  %v266_v32 = vmul.f32 %v264_v30, %v231_v0 }
  0x62   : > { %v271_v33 = vrot.slane %v259_v31, %v263_v25 }
  0x64   : > { %v273_v34 = vadd.f32 %v271_v33, %v266_v32 }
  0x66   : > { %274 = vst.msk [vmem:[%s224_s18] sm:$0xff] %vm232_vm0, %v273_v34 }
  0x67   : > { %516 = shalt.err (!%p513_p6)
}
  0x68   : > { %s517_s5 = scalar_lea.hbm %s746_s28, 128  ;;  %s521_s24 = scalar_lea.hbm %s797_s3, 256 }
  0x69   : > { %p518_p4 = scmp.ne.s32.totalorder %s746_s28, %s517_s5  ;;  %p522_p1 = scmp.lt.u32.totalorder %s746_s28, %s797_s3 }
  0x6a   : > { %p523_p2 = scmp.lt.u32.totalorder %s521_s24, %s517_s5  ;;  %p525_p8 = scmp.lt.u32.totalorder %s517_s5, %s746_s28 }
  0x6b   : > { %p519_p10 = pnand %p518_p4, %p806_p9 }
  0x6c   : > { %p524_p5 = por %p523_p2, %p522_p1 }
  0x6d   : > { %p520_p12 = pneg %p519_p10 }
  0x6e   : > { %p526_p11 = por %p525_p8, %p524_p5 }
  0x70   : > { %p527_p0 = pnand %p526_p11, %p520_p12 }
  0x72   : > { %530 = shalt.err (!%p527_p0)
}
  0x73   : > { %411 = dma.vmem_to_hbm [thread:$0]  (%p806_p9), %s741_s19, 128, %s746_s28, %s276_s29  }
  0x74 PF: > { %s302_s10 = sand.u32 1, %s565_s12   ;;  %p807_p7 = scmp.ne.s32.totalorder %s802_s27, 0 }
  0x75   : > { %p808_p13 = scmp.ge.s32.totalorder %s585_s17, 2  ;;  %s303_s18 = scalar_lea.sflag [#allocation4], %s302_s10 }
  0x77   : > { %p418_p3 = pnand %p808_p13, %p807_p7 }
  0x79   : > { %560 = dma.done.wait (!%p418_p3), %s303_s18, 128  }
  0x7a   : > { %562 = vsyncadd (!%p418_p3), %s303_s18, 4294967168  ;;  %s19_s17 = sadd.s32 1, %s585_s17   ;;  %s809_s12 = smov %s569_s13 }
  0x7b   : > { %p16_p6 = scmp.ge.s32.totalorder %s19_s17, 4   ;;  %s810_s13 = smov %s573_s14 }
  0x7c   : > { %s811_s14 = smov %s665_s26  ;;  %s812_s15 = smov %s581_s16 }
  0x7d   : > { %s813_s16 = smov %s815_s20  ;;  %18 = sbr.rel (!%p16_p6) target bundleno = 6 (0x6), region = 83 }
  0x84   :  { %308 = vsyncpa [#allocation3], 1 }
  0x85   :  { %310 = vsyncpa [#allocation3 + $0x1], 1 }
  0x86   :  { %311 = vsyncpa [#allocation4], 1 }
  0x87   :  { %313 = vsyncpa [#allocation4 + $0x1], 1 }

</bundles_post_ra>
